<compile_context>
chip_gen: v5e
topology: v5e:2x2
jax: 0.10.0
libtpu: 0.0.40
codegen_flags: <defaults>
</compile_context>

<pallas_src>
import functools

import jax
import jax.numpy as jnp
from jax.experimental import pallas as pl
from jax.experimental.pallas import tpu as pltpu


_VMEM_PIPELINE_BUDGET = 20 * 1024 * 1024   # double-buffered working-set target
_VMEM_LIMIT_BYTES = 32 * 1024 * 1024       # > v5e's 16 MiB scoped default,
                                           # < v7x's 64 MiB physical VMEM


def _round_up(x, m):
    return ((x + m - 1) // m) * m


def _cdiv(a, b):
    return -(-a // b)


def _pick_row_tile(m_packed, d, pack, max_tm=8192):
    """Packed-row tile: VMEM-budgeted, multiple of 8, balanced across grid steps."""
    d_pad = _round_up(d, 128)            # lane padding of input tiles in VMEM
    out_pad = _round_up(pack, 128)       # lane padding of the (tm, pack) outputs
    bytes_per_row = 2 * (3 * d_pad + 2 * out_pad) * 4   # 2x = double buffering
    tm = max(8, _VMEM_PIPELINE_BUDGET // bytes_per_row)
    tm = min(tm, max_tm, _round_up(m_packed, 8))
    tm = max(8, (tm // 8) * 8)
    # Re-balance so the last grid step is not mostly padding.
    n_steps = _cdiv(m_packed, tm)
    tm = _round_up(_cdiv(m_packed, n_steps), 8)
    return tm


def _disc_kernel(c_ref, hpl_ref, hmi_ref, w_ref, g_ref, b_ref, sc1_ref, sc2_ref):
    # c/hpl/hmi: (tm, pack*n_h) lane-packed VMEM tiles.
    # w: block-diag W^T (pack*n_h, pack*n_h), grid-invariant VMEM resident.
    # g: segmented-ones reduce matrix (pack*n_h, pack), grid-invariant.
    # b: (1,) SMEM scalar bias.  sc1/sc2: (tm, pack) lane-packed score blocks.
    u = jnp.dot(c_ref[...], w_ref[...], preferred_element_type=jnp.float32)  # MXU
    g = g_ref[...]
    b = b_ref[0]
    # Row dot-products as MXU reductions (free slot vs. the XLU lane reduce);
    # result is already in the lane-packed (tm, pack) output layout.
    s1 = jnp.dot(hpl_ref[...] * u, g, preferred_element_type=jnp.float32) + b
    s2 = jnp.dot(hmi_ref[...] * u, g, preferred_element_type=jnp.float32) + b
    sc1_ref[...] = s1.astype(sc1_ref.dtype)
    sc2_ref[...] = s2.astype(sc2_ref.dtype)


def _bilinear_pair_scores(c_rows, hpl_rows, hmi_rows, weight, bias, *, max_tm=8192):
    """c/hpl/hmi: (M, n_h) f32; weight: (n_h, n_h); bias: (1,) -> two (M,) scores."""
    M, n_h = c_rows.shape

    # Lane packing factor: `pack` logical rows share one 128-lane vreg row.
    pack = 128 // n_h if (n_h <= 128 and 128 % n_h == 0) else 1
    d = pack * n_h

    wt = weight.T.astype(jnp.float32)                       # u = c @ W^T
    if pack > 1:
        eye = jnp.eye(pack, dtype=jnp.float32)
        w_eff = jnp.kron(eye, wt)                           # block-diagonal W^T
        g = jnp.kron(eye, jnp.ones((n_h, 1), jnp.float32))  # segmented row reduce
    else:
        w_eff = wt
        g = jnp.ones((n_h, 1), jnp.float32)

    m_packed = _cdiv(M, pack)
    tm = _pick_row_tile(m_packed, d, pack, max_tm)
    grid = _cdiv(m_packed, tm)
    M_pad = grid * tm * pack

    if M_pad != M:
        pad = ((0, M_pad - M), (0, 0))
        c_rows = jnp.pad(c_rows, pad)
        hpl_rows = jnp.pad(hpl_rows, pad)
        hmi_rows = jnp.pad(hmi_rows, pad)

    cp = c_rows.reshape(M_pad // pack, d)       # free reshape in HBM (row-major)
    hp = hpl_rows.reshape(M_pad // pack, d)
    hm = hmi_rows.reshape(M_pad // pack, d)

    row_spec = pl.BlockSpec((tm, d), lambda i: (i, 0))
    out_spec = pl.BlockSpec((tm, pack), lambda i: (i, 0))
    out_sds = jax.ShapeDtypeStruct((grid * tm, pack), jnp.float32)

    cost = pl.CostEstimate(
        flops=int(2 * M * n_h * n_h + 6 * M * n_h),
        transcendentals=0,
        bytes_accessed=int(3 * M * n_h * 4 + 2 * M * 4 + n_h * n_h * 4))

    sc1, sc2 = pl.pallas_call(
        _disc_kernel,
        out_shape=(out_sds, out_sds),
        grid_spec=pltpu.PrefetchScalarGridSpec(
            num_scalar_prefetch=0,
            grid=(grid,),
            in_specs=[
                row_spec,                                            # c (packed)
                row_spec,                                            # h_pl (packed)
                row_spec,                                            # h_mi (packed)
                pl.BlockSpec((d, d), lambda i: (0, 0)),              # block-diag W^T
                pl.BlockSpec((d, pack), lambda i: (0, 0)),           # reduce matrix
                pl.BlockSpec(memory_space=pltpu.MemorySpace.SMEM),   # bias scalar
            ],
            out_specs=(out_spec, out_spec),
        ),
        compiler_params=pltpu.CompilerParams(
            dimension_semantics=("parallel",),
            vmem_limit_bytes=_VMEM_LIMIT_BYTES),
        cost_estimate=cost,
    )(cp, hp, hm, w_eff, g, bias)

    return sc1.reshape(M_pad)[:M], sc2.reshape(M_pad)[:M]


def discriminator_forward(c, h_pl, h_mi, weight, bias,
                          s_bias1=None, s_bias2=None, *, max_tm=8192):
    """c, h_pl, h_mi: (B, N, n_h) float32. Returns logits (B, 2N)."""
    B, N, n_h = c.shape
    M = B * N
    sc1, sc2 = _bilinear_pair_scores(
        c.reshape(M, n_h), h_pl.reshape(M, n_h), h_mi.reshape(M, n_h),
        weight, bias, max_tm=max_tm)
    sc_1 = sc1.reshape(B, N)
    sc_2 = sc2.reshape(B, N)
    if s_bias1 is not None:
        sc_1 = sc_1 + s_bias1
    if s_bias2 is not None:
        sc_2 = sc_2 + s_bias2
    return jnp.concatenate([sc_1, sc_2], axis=1)                     # (B, 2N)


def _reference_forward(c, h_pl, h_mi, weight, bias, s_bias1=None, s_bias2=None):
    # Pure-JAX reference of nn.Bilinear(n_h, n_h, 1) applied twice + concat.
    def bil(h):
        return jnp.einsum("bni,ij,bnj->bn", h, weight, c,
                          precision=jax.lax.Precision.HIGHEST) + bias[0]
    s1, s2 = bil(h_pl), bil(h_mi)
    if s_bias1 is not None:
        s1 = s1 + s_bias1
    if s_bias2 is not None:
        s2 = s2 + s_bias2
    return jnp.concatenate([s1, s2], axis=1)


def _run_case(key, B, N, n_h):
    k_c, k_pl, k_mi, k_w, k_b1 = jax.random.split(key, 5)
    c = jax.random.normal(k_c, (B, N, n_h), dtype=jnp.float32)
    h_pl = jax.random.normal(k_pl, (B, N, n_h), dtype=jnp.float32)
    h_mi = jax.random.normal(k_mi, (B, N, n_h), dtype=jnp.float32)

    # Deterministic xavier_uniform-style init for nn.Bilinear weight (1, n_h, n_h).
    bound = (6.0 / (n_h * n_h + n_h)) ** 0.5
    weight = jax.random.uniform(k_w, (n_h, n_h), dtype=jnp.float32,
                                minval=-bound, maxval=bound)
    bias = jnp.zeros((1,), dtype=jnp.float32)      # m.bias.data.fill_(0.0)
    s_bias1 = jax.random.normal(k_b1, (B, N), dtype=jnp.float32)

    fwd = jax.jit(functools.partial(discriminator_forward))
    logits = jax.block_until_ready(fwd(c, h_pl, h_mi, weight, bias))
    ref = _reference_forward(c, h_pl, h_mi, weight, bias)
    assert logits.shape == (B, 2 * N), logits.shape
    assert jnp.allclose(logits, ref, atol=2e-4, rtol=2e-4), (
        float(jnp.max(jnp.abs(logits - ref))))

    # Optional additive score biases (wrapper-level, as in the PyTorch module).
    logits_b = jax.block_until_ready(
        discriminator_forward(c, h_pl, h_mi, weight, bias, s_bias1=s_bias1))
    ref_b = _reference_forward(c, h_pl, h_mi, weight, bias, s_bias1=s_bias1)
    assert jnp.allclose(logits_b, ref_b, atol=2e-4, rtol=2e-4), (
        float(jnp.max(jnp.abs(logits_b - ref_b))))


if __name__ == "__main__":
    key = jax.random.PRNGKey(0)
    k0, k1 = jax.random.split(key)
    _run_case(k0, B=2, N=8, n_h=32)     # lane-packed path (pack = 4)
    _run_case(k1, B=2, N=8, n_h=256)    # generic path (pack = 1)
    print("KERNEL_OK")
</pallas_src>

<mosaic_0001>
module attributes {stable_mosaic.version = 11 : i64} {
  func.func @_disc_kernel(%arg0: i32, %arg1: memref<8x128xf32, #tpu.memory_space<vmem>>, %arg2: memref<8x128xf32, #tpu.memory_space<vmem>>, %arg3: memref<8x128xf32, #tpu.memory_space<vmem>>, %arg4: memref<128x128xf32, #tpu.memory_space<vmem>>, %arg5: memref<128x4xf32, #tpu.memory_space<vmem>>, %arg6: memref<1xf32, #tpu.memory_space<smem>>, %arg7: memref<8x4xf32, #tpu.memory_space<vmem>>, %arg8: memref<8x4xf32, #tpu.memory_space<vmem>>) attributes {dimension_semantics = [#tpu.dimension_semantics<parallel>], iteration_bounds = array<i64: 1>, scalar_prefetch = 0 : i64, scratch_operands = 0 : i64, tpu.core_type = #tpu.core_type<tc>, window_params = [{transform_indices = @transform_0, window_bounds = array<i64: 8, 128>}, {transform_indices = @transform_1, window_bounds = array<i64: 8, 128>}, {transform_indices = @transform_2, window_bounds = array<i64: 8, 128>}, {pipeline_mode = #tpu.pipeline_mode<synchronous>, transform_indices = @transform_3, window_bounds = array<i64: 128, 128>}, {pipeline_mode = #tpu.pipeline_mode<synchronous>, transform_indices = @transform_4, window_bounds = array<i64: 128, 4>}, {transform_indices = @transform_5, window_bounds = array<i64: 1>}, {transform_indices = @transform_6, window_bounds = array<i64: 8, 4>}, {transform_indices = @transform_7, window_bounds = array<i64: 8, 4>}]} {
    %c0 = arith.constant 0 : index
    %c0_0 = arith.constant 0 : index
    %0 = vector.load %arg1[%c0, %c0_0] : memref<8x128xf32, #tpu.memory_space<vmem>>, vector<8x128xf32>
    %c0_1 = arith.constant 0 : index
    %c0_2 = arith.constant 0 : index
    %1 = vector.load %arg4[%c0_1, %c0_2] : memref<128x128xf32, #tpu.memory_space<vmem>>, vector<128x128xf32>
    %cst = arith.constant dense<0.000000e+00> : vector<8x128xf32>
    %2 = tpu.matmul %0, %1, %cst {dimension_numbers = #tpu.dot_dimension_numbers<[1], [0], [0], [1], [0, 0, 1, 1], [], []>} : vector<8x128xf32>, vector<128x128xf32>, vector<8x128xf32> -> vector<8x128xf32>
    %c0_3 = arith.constant 0 : index
    %c0_4 = arith.constant 0 : index
    %3 = vector.load %arg5[%c0_3, %c0_4] : memref<128x4xf32, #tpu.memory_space<vmem>>, vector<128x4xf32>
    %c0_5 = arith.constant 0 : index
    %4 = memref.load %arg6[%c0_5] : memref<1xf32, #tpu.memory_space<smem>>
    %c0_6 = arith.constant 0 : index
    %c0_7 = arith.constant 0 : index
    %5 = vector.load %arg2[%c0_6, %c0_7] : memref<8x128xf32, #tpu.memory_space<vmem>>, vector<8x128xf32>
    %6 = arith.mulf %5, %2 : vector<8x128xf32>
    %cst_8 = arith.constant dense<0.000000e+00> : vector<8x4xf32>
    %7 = tpu.matmul %6, %3, %cst_8 {dimension_numbers = #tpu.dot_dimension_numbers<[1], [0], [0], [1], [0, 0, 1, 1], [], []>} : vector<8x128xf32>, vector<128x4xf32>, vector<8x4xf32> -> vector<8x4xf32>
    %8 = vector.broadcast %4 : f32 to vector<8x4xf32>
    %9 = arith.addf %7, %8 : vector<8x4xf32>
    %c0_9 = arith.constant 0 : index
    %c0_10 = arith.constant 0 : index
    %10 = vector.load %arg3[%c0_9, %c0_10] : memref<8x128xf32, #tpu.memory_space<vmem>>, vector<8x128xf32>
    %11 = arith.mulf %10, %2 : vector<8x128xf32>
    %cst_11 = arith.constant dense<0.000000e+00> : vector<8x4xf32>
    %12 = tpu.matmul %11, %3, %cst_11 {dimension_numbers = #tpu.dot_dimension_numbers<[1], [0], [0], [1], [0, 0, 1, 1], [], []>} : vector<8x128xf32>, vector<128x4xf32>, vector<8x4xf32> -> vector<8x4xf32>
    %13 = vector.broadcast %4 : f32 to vector<8x4xf32>
    %14 = arith.addf %12, %13 : vector<8x4xf32>
    %c0_12 = arith.constant 0 : index
    %c0_13 = arith.constant 0 : index
    %15 = vector.load %arg7[%c0_12, %c0_13] : memref<8x4xf32, #tpu.memory_space<vmem>>, vector<8x4xf32>
    tpu.vector_store %arg7[%c0_12, %c0_13], %9 {strides = array<i32>} : memref<8x4xf32, #tpu.memory_space<vmem>>, vector<8x4xf32>,
    %c0_14 = arith.constant 0 : index
    %c0_15 = arith.constant 0 : index
    %16 = vector.load %arg8[%c0_14, %c0_15] : memref<8x4xf32, #tpu.memory_space<vmem>>, vector<8x4xf32>
    tpu.vector_store %arg8[%c0_14, %c0_15], %14 {strides = array<i32>} : memref<8x4xf32, #tpu.memory_space<vmem>>, vector<8x4xf32>,
    return
  }
  func.func @transform_0(%arg0: i32) -> (i32, i32) {
    %c0_i32 = arith.constant 0 : i32
    %c0_i32_0 = arith.constant 0 : i32
    return %arg0, %c0_i32 : i32, i32
  }
  func.func @transform_1(%arg0: i32) -> (i32, i32) {
    %c0_i32 = arith.constant 0 : i32
    %c0_i32_0 = arith.constant 0 : i32
    return %arg0, %c0_i32 : i32, i32
  }
  func.func @transform_2(%arg0: i32) -> (i32, i32) {
    %c0_i32 = arith.constant 0 : i32
    %c0_i32_0 = arith.constant 0 : i32
    return %arg0, %c0_i32 : i32, i32
  }
  func.func @transform_3(%arg0: i32) -> (i32, i32) {
    %c0_i32 = arith.constant 0 : i32
    %c0_i32_0 = arith.constant 0 : i32
    %c0_i32_1 = arith.constant 0 : i32
    return %c0_i32, %c0_i32_0 : i32, i32
  }
  func.func @transform_4(%arg0: i32) -> (i32, i32) {
    %c0_i32 = arith.constant 0 : i32
    %c0_i32_0 = arith.constant 0 : i32
    %c0_i32_1 = arith.constant 0 : i32
    return %c0_i32, %c0_i32_0 : i32, i32
  }
  func.func @transform_5(%arg0: i32) -> i32 {
    %c0_i32 = arith.constant 0 : i32
    %c0_i32_0 = arith.constant 0 : i32
    return %c0_i32 : i32
  }
  func.func @transform_6(%arg0: i32) -> (i32, i32) {
    %c0_i32 = arith.constant 0 : i32
    %c0_i32_0 = arith.constant 0 : i32
    return %arg0, %c0_i32 : i32, i32
  }
  func.func @transform_7(%arg0: i32) -> (i32, i32) {
    %c0_i32 = arith.constant 0 : i32
    %c0_i32_0 = arith.constant 0 : i32
    return %arg0, %c0_i32 : i32, i32
  }
}

</mosaic_0001>

<bundles_post_ra>
// kernel: discriminator_forward.1
= control target key start
LH: loop header
LB: loop body
LE: loop exit
PB: predicated region body
PF: predicated region fallthrough
CT: control target
= control target key end

     0   :  { %vm125_vm0 = vcmask 31744   ;;  %s290_s3 = inlined_call_operand.vmem [shape: f32[128,128], index: 3, kind: input, shape index: {}]   ;;  %s291_s4 = inlined_call_operand.vmem [shape: f32[128,4], index: 4, kind: input, shape index: {}]   ;;  %s292_s0 = inlined_call_operand.vmem [shape: f32[8,128], index: 0, kind: input, shape index: {}]   ;;  %s293_s1 = inlined_call_operand.vmem [shape: f32[8,128], index: 1, kind: input, shape index: {}]   ;;  %s294_s2 = inlined_call_operand.vmem [shape: f32[8,128], index: 2, kind: input, shape index: {}]   ;;  %s295_s5 = inlined_call_operand.<no memory space> [shape: f32[1], index: 5, kind: input, shape index: {}]   ;;  %s296_s6 = inlined_call_operand.vmem [shape: f32[8,4], index: 6, kind: output, shape index: {0}]   ;;  %s297_s7 = inlined_call_operand.vmem [shape: f32[8,4], index: 7, kind: output, shape index: {1}]  }
   0x1   :  { %v42_v0 = vld [vmem:[%s290_s3 + $0x78] sm:$0xff]  ;;  %v41_v1 = vld [vmem:[%s290_s3 + $0x70] sm:$0xff]  ;;  %v40_v2 = vld [vmem:[%s290_s3 + $0x68] sm:$0xff]  ;;  %v82_v38 = vstv %s295_s5 }
   0x2   :  { %43 = vmatpush.msra.mxu0 %v42_v0  ;;  %v39_v3 = vld [vmem:[%s290_s3 + $0x60] sm:$0xff]  ;;  %v78_v4 = vld [vmem:[%s291_s4 + $0x78] sm:$0xff]  ;;  %v77_v6 = vld [vmem:[%s291_s4 + $0x70] sm:$0xff] }
   0x3   :  { %v38_v5 = vld [vmem:[%s290_s3 + $0x58] sm:$0xff]  ;;  %83 = vmatpush.msra.mxu1 %v78_v4  ;;  %105 = vmatpush.msra.mxu2 %v78_v4  ;;  %v76_v7 = vld [vmem:[%s291_s4 + $0x68] sm:$0xff]  ;;  %v37_v8 = vld [vmem:[%s290_s3 + $0x50] sm:$0xff] }
   0x4   :  { %44 = vmatpush.msra.mxu0 %v41_v1  ;;  %v75_v9 = vld [vmem:[%s291_s4 + $0x60] sm:$0xff]  ;;  %v36_v10 = vld [vmem:[%s290_s3 + $0x48] sm:$0xff]  ;;  %v74_v11 = vld [vmem:[%s291_s4 + $0x58] sm:$0xff] }
   0x5   :  { %84 = vmatpush.msra.mxu1 %v77_v6  ;;  %106 = vmatpush.msra.mxu2 %v77_v6  ;;  %v35_v12 = vld [vmem:[%s290_s3 + $0x40] sm:$0xff]  ;;  %v73_v13 = vld [vmem:[%s291_s4 + $0x50] sm:$0xff]  ;;  %v34_v14 = vld [vmem:[%s290_s3 + $0x38] sm:$0xff] }
   0x6   :  { %45 = vmatpush.msra.mxu0 %v40_v2  ;;  %v72_v15 = vld [vmem:[%s291_s4 + $0x48] sm:$0xff]  ;;  %v33_v16 = vld [vmem:[%s290_s3 + $0x30] sm:$0xff]  ;;  %v71_v17 = vld [vmem:[%s291_s4 + $0x40] sm:$0xff] }
   0x7   :  { %85 = vmatpush.msra.mxu1 %v76_v7  ;;  %107 = vmatpush.msra.mxu2 %v76_v7  ;;  %v32_v18 = vld [vmem:[%s290_s3 + $0x28] sm:$0xff]  ;;  %v70_v19 = vld [vmem:[%s291_s4 + $0x38] sm:$0xff]  ;;  %v31_v20 = vld [vmem:[%s290_s3 + $0x20] sm:$0xff] }
   0x8   :  { %46 = vmatpush.msra.mxu0 %v39_v3  ;;  %v69_v21 = vld [vmem:[%s291_s4 + $0x30] sm:$0xff]  ;;  %v30_v22 = vld [vmem:[%s290_s3 + $0x18] sm:$0xff]  ;;  %v68_v23 = vld [vmem:[%s291_s4 + $0x28] sm:$0xff] }
   0x9   :  { %86 = vmatpush.msra.mxu1 %v75_v9  ;;  %108 = vmatpush.msra.mxu2 %v75_v9  ;;  %v29_v24 = vld [vmem:[%s290_s3 + $0x10] sm:$0xff]  ;;  %v67_v25 = vld [vmem:[%s291_s4 + $0x20] sm:$0xff]  ;;  %v28_v26 = vld [vmem:[%s290_s3 + $0x8] sm:$0xff] }
   0xa   :  { %47 = vmatpush.msra.mxu0 %v38_v5  ;;  %v66_v27 = vld [vmem:[%s291_s4 + $0x18] sm:$0xff]  ;;  %v27_v28 = vld [vmem:[%s290_s3] sm:$0xff]  ;;  %v65_v30 = vld [vmem:[%s291_s4 + $0x10] sm:$0xff] }
   0xb   :  { %87 = vmatpush.msra.mxu1 %v74_v11  ;;  %109 = vmatpush.msra.mxu2 %v74_v11  ;;  %v26_v29 = vld [vmem:[%s292_s0] sm:$0xff]  ;;  %v64_v31 = vld [vmem:[%s291_s4 + $0x8] sm:$0xff] }
   0xc   :  { %48 = vmatpush.msra.mxu0 %v37_v8  ;;  %v63_v32 = vld [vmem:[%s291_s4] sm:$0xff] }
   0xd   :  { %88 = vmatpush.msra.mxu1 %v73_v13  ;;  %110 = vmatpush.msra.mxu2 %v73_v13  ;;  %v80_v33 = vld [vmem:[%s293_s1] sm:$0xff] }
   0xe   :  { %49 = vmatpush.msra.mxu0 %v36_v10  ;;  %v103_v34 = vld [vmem:[%s294_s2] sm:$0xff] }
   0xf   :  { %89 = vmatpush.msra.mxu1 %v72_v15  ;;  %111 = vmatpush.msra.mxu2 %v72_v15 }
  0x10   :  { %50 = vmatpush.msra.mxu0 %v35_v12 }
  0x11   :  { %90 = vmatpush.msra.mxu1 %v71_v17  ;;  %112 = vmatpush.msra.mxu2 %v71_v17 }
  0x12   :  { %51 = vmatpush.msra.mxu0 %v34_v14 }
  0x13   :  { %91 = vmatpush.msra.mxu1 %v70_v19  ;;  %113 = vmatpush.msra.mxu2 %v70_v19 }
  0x14   :  { %52 = vmatpush.msra.mxu0 %v33_v16 }
  0x15   :  { %92 = vmatpush.msra.mxu1 %v69_v21  ;;  %114 = vmatpush.msra.mxu2 %v69_v21 }
  0x16   :  { %53 = vmatpush.msra.mxu0 %v32_v18 }
  0x17   :  { %93 = vmatpush.msra.mxu1 %v68_v23  ;;  %115 = vmatpush.msra.mxu2 %v68_v23 }
  0x18   :  { %54 = vmatpush.msra.mxu0 %v31_v20 }
  0x19   :  { %94 = vmatpush.msra.mxu1 %v67_v25  ;;  %116 = vmatpush.msra.mxu2 %v67_v25 }
  0x1a   :  { %55 = vmatpush.msra.mxu0 %v30_v22 }
  0x1b   :  { %95 = vmatpush.msra.mxu1 %v66_v27  ;;  %117 = vmatpush.msra.mxu2 %v66_v27 }
  0x1c   :  { %56 = vmatpush.msra.mxu0 %v29_v24 }
  0x1d   :  { %96 = vmatpush.msra.mxu1 %v65_v30  ;;  %118 = vmatpush.msra.mxu2 %v65_v30 }
  0x1e   :  { %57 = vmatpush.msra.mxu0 %v28_v26 }
  0x1f   :  { %97 = vmatpush.msra.mxu1 %v64_v31  ;;  %119 = vmatpush.msra.mxu2 %v64_v31 }
  0x20   :  { %58 = vmatpush.msra.mxu0 %v27_v28 }
  0x21   :  { %59 = vmatmul.f32.vlgmr.msra.gmra.mxu0 %v26_v29  ;;  %98 = vmatpush.msra.mxu1 %v63_v32 }
  0x22   :  { %120 = vmatpush.msra.mxu2 %v63_v32 }
  0x9e   :  { %v60_v35 = vpop.f32.mrf.mxu0 }
  0x9f   :  { %v81_v36 = vmul.f32 %v80_v33, %v60_v35  ;;  %v104_v37 = vmul.f32 %v103_v34, %v60_v35 }
  0xa1   :  { %99 = vmatmul.f32.vlgmr.msra.gmra.mxu1 %v81_v36  ;;  %121 = vmatmul.f32.vlgmr.msra.gmra.mxu2 %v104_v37 }
 0x11e   :  { %v100_v39 = vpop.f32.mrf.mxu1 }
 0x11f   :  { %v101_v40 = vadd.f32 %v100_v39, %v82_v38 }
 0x121   :  { %126 = vst.msk [vmem:[%s296_s6] sm:$0xff] %vm125_vm0, %v101_v40 }
 0x124   :  { %v122_v41 = vpop.f32.mrf.mxu2 }
 0x125   :  { %v123_v42 = vadd.f32 %v122_v41, %v82_v38 }
 0x127   :  { %127 = vst.msk [vmem:[%s297_s7] sm:$0xff] %vm125_vm0, %v123_v42 }

</bundles_post_ra>
